<compile_context>
chip_gen: v7x
topology: tpu7x:2x2x1
jax: 0.10.0
libtpu: 0.0.40
codegen_flags: <defaults>
</compile_context>

<pallas_src>
import functools

import numpy as np
import jax
import jax.numpy as jnp
from jax.experimental import pallas as pl
from jax.experimental.pallas import tpu as pltpu

SIZES = (1, 3, 6, 8)
_SUBLANE = 8


def _round_up(x: int, m: int) -> int:
    return ((x + m - 1) // m) * m


def _round_down(x: int, m: int) -> int:
    return (x // m) * m


@functools.lru_cache(maxsize=None)
def _build_pool_matrix_np(L: int, sizes: tuple) -> np.ndarray:
    """(L, sum(sizes)) f32 matrix for concatenated AdaptiveAvgPool1d."""
    out_len = sum(sizes)
    mat = np.zeros((L, out_len), dtype=np.float32)
    l = np.arange(L)[:, None]
    col = 0
    for S in sizes:
        o = np.arange(S)
        starts = (o * L) // S                    # floor(o*L/S)
        ends = -((-(o + 1) * L) // S)            # ceil((o+1)*L/S)
        mask = (l >= starts[None, :]) & (l < ends[None, :])
        mat[:, col:col + S] = mask / (ends - starts)[None, :].astype(np.float32)
        col += S
    return mat


def _vmem_budget() -> tuple:
    """Generation-aware (buffer_budget_bytes, vmem_limit_bytes)."""
    cap = None
    try:
        cap = getattr(pltpu.get_tpu_info(), "vmem_capacity_bytes", None)
    except Exception:
        cap = None
    if not cap:
        cap = 64 * 1024 * 1024        # conservative default: v7x per-TC VMEM
    budget = int(cap * 0.60)          # space for Pallas-managed buffers
    limit = int(cap * 0.75)           # headroom for Mosaic internal scratch
    return budget, limit


def _choose_tm(rows: int, L: int, out_len: int, in_itemsize: int,
               budget_bytes: int) -> int:
    """Row tile (multiple of 8) sized for HBM-roofline tiles within budget."""
    per_row = 2 * L * in_itemsize + 2 * out_len * 4   # dbl-buffered in/out rows
    fixed = 2 * L * out_len * 4                       # resident pooling matrix
    avail = max(budget_bytes - fixed, _SUBLANE * per_row)
    tm = max(_SUBLANE, _round_down(avail // per_row, _SUBLANE))

    # Keep the per-step input tile in the measured HBM sweet spot (multi-MiB);
    # 16 MiB per buffer keeps the double-buffered footprint well inside every
    # generation's budget while not throttling short-L configurations.
    target_in_tile = 16 * 1024 * 1024
    cap = max(1024, target_in_tile // max(L * in_itemsize, 1))
    tm = min(tm, max(_SUBLANE, _round_down(cap, _SUBLANE)))

    rows8 = _round_up(rows, _SUBLANE)
    tm = min(tm, rows8)

    # Prefer >= 2 grid steps: BlockSpec double-buffering needs multiple steps
    # to overlap DMA with the matmul, and the "parallel" axis shards across
    # v7x's two TensorCores (grid == 1 would idle one of them).
    if rows8 > _SUBLANE:
        max_tm = _round_up(rows8 // 2, _SUBLANE)
        if max_tm >= rows8:
            max_tm = rows8 - _SUBLANE
        tm = min(tm, max(max_tm, _SUBLANE))
    return int(tm)


def _psp_kernel(x_ref, p_ref, o_ref, *, precision):
    # x_ref: (TM, L), p_ref: (L, out_len), o_ref: (TM, out_len).
    # One MXU matmul per row tile, f32 accumulation.
    o_ref[...] = jnp.dot(
        x_ref[...], p_ref[...],
        preferred_element_type=jnp.float32,
        precision=precision,
    ).astype(o_ref.dtype)


def psp_module(feats: jnp.ndarray, sizes=SIZES, *,
               use_bf16_inputs: bool = False) -> jnp.ndarray:
    """feats: (N, C, L) -> (N, C, sum(sizes)), matching PyTorch PSPModule."""
    n, c, L = feats.shape
    sizes = tuple(int(s) for s in sizes)
    out_len = sum(sizes)
    rows = n * c

    pool_np = _build_pool_matrix_np(L, sizes)

    if use_bf16_inputs:
        # ~2x throughput for this HBM-read-bound kernel; ~1e-3 relative error.
        x2d = feats.reshape(rows, L).astype(jnp.bfloat16)
        pool_mat = jnp.asarray(pool_np, dtype=jnp.bfloat16)
        precision = jax.lax.Precision.DEFAULT
    else:
        x2d = feats.reshape(rows, L)
        pool_mat = jnp.asarray(pool_np)
        # Full-f32 MXU passes are free (kernel is DMA-bound) and guarantee
        # exact PyTorch f32 semantics at any L.
        precision = jax.lax.Precision.HIGHEST

    in_itemsize = jnp.dtype(x2d.dtype).itemsize
    p_itemsize = jnp.dtype(pool_mat.dtype).itemsize
    budget, vmem_limit = _vmem_budget()
    tm = _choose_tm(rows, L, out_len, in_itemsize, budget)
    grid = (pl.cdiv(rows, tm),)

    cost = pl.CostEstimate(
        flops=2 * rows * L * out_len,
        transcendentals=0,
        bytes_accessed=rows * L * in_itemsize
        + rows * out_len * 4
        + L * out_len * p_itemsize,
    )

    # No wrapper-side padding: if rows % tm != 0, Pallas handles the partial
    # last block.  Garbage rows of that input tile only affect garbage output
    # rows inside the block (the matmul is row-independent) and the writeback
    # of the out-of-bounds portion is masked by Pallas.
    out2d = pl.pallas_call(
        functools.partial(_psp_kernel, precision=precision),
        out_shape=jax.ShapeDtypeStruct((rows, out_len), jnp.float32),
        grid=grid,
        in_specs=[
            pl.BlockSpec((tm, L), lambda i: (i, 0)),        # row tile of feats
            pl.BlockSpec((L, out_len), lambda i: (0, 0)),   # pooling matrix
        ],
        out_specs=pl.BlockSpec((tm, out_len), lambda i: (i, 0)),
        compiler_params=pltpu.CompilerParams(
            dimension_semantics=("parallel",),   # shards across TCs on v7x
            vmem_limit_bytes=vmem_limit,
        ),
        cost_estimate=cost,
    )(x2d, pool_mat)

    return out2d.reshape(n, c, out_len).astype(feats.dtype)


def _reference_psp(feats, sizes=SIZES):
    """Pure-JAX reference for AdaptiveAvgPool1d + concat (sanity check)."""
    outs = []
    L = feats.shape[-1]
    for S in sizes:
        cols = []
        for o in range(S):
            start = (o * L) // S
            end = -((-(o + 1) * L) // S)
            cols.append(jnp.mean(feats[:, :, start:end], axis=-1, keepdims=True))
        outs.append(jnp.concatenate(cols, axis=-1))
    return jnp.concatenate(outs, axis=-1)


if __name__ == "__main__":
    key = jax.random.PRNGKey(0)

    # Small shapes consistent with the forward: (N, C, L) = (2, 4, 16).
    feats = jax.random.normal(key, (2, 4, 16), dtype=jnp.float32)
    out = psp_module(feats)
    out = jax.block_until_ready(out)
    ref = _reference_psp(feats)
    assert out.shape == (2, 4, sum(SIZES)), out.shape
    assert jnp.allclose(out, ref, atol=1e-5, rtol=1e-5), "mismatch vs reference"

    # Second small case exercising a multi-step grid with a partial last block
    # (rows = 24, tm = 16 -> grid = 2, last block has 8 valid rows).
    feats2 = jax.random.normal(jax.random.PRNGKey(1), (2, 12, 40), dtype=jnp.float32)
    out2 = jax.block_until_ready(psp_module(feats2))
    ref2 = _reference_psp(feats2)
    assert out2.shape == (2, 12, sum(SIZES)), out2.shape
    assert jnp.allclose(out2, ref2, atol=1e-5, rtol=1e-5), "mismatch vs reference (partial block)"

    print("KERNEL_OK")
</pallas_src>

<mosaic_0001>
module attributes {stable_mosaic.version = 11 : i64} {
  func.func @_psp_kernel(%arg0: i32, %arg1: memref<8x16xf32, #tpu.memory_space<vmem>>, %arg2: memref<16x18xf32, #tpu.memory_space<vmem>>, %arg3: memref<8x18xf32, #tpu.memory_space<vmem>>) attributes {dimension_semantics = [#tpu.dimension_semantics<parallel>], iteration_bounds = array<i64: 1>, scalar_prefetch = 0 : i64, scratch_operands = 0 : i64, tpu.core_type = #tpu.core_type<tc>, window_params = [{transform_indices = @transform_0, window_bounds = array<i64: 8, 16>}, {pipeline_mode = #tpu.pipeline_mode<synchronous>, transform_indices = @transform_1, window_bounds = array<i64: 16, 18>}, {transform_indices = @transform_2, window_bounds = array<i64: 8, 18>}]} {
    %c0 = arith.constant 0 : index
    %c0_0 = arith.constant 0 : index
    %0 = vector.load %arg1[%c0, %c0_0] : memref<8x16xf32, #tpu.memory_space<vmem>>, vector<8x16xf32>
    %c0_1 = arith.constant 0 : index
    %c0_2 = arith.constant 0 : index
    %1 = vector.load %arg2[%c0_1, %c0_2] : memref<16x18xf32, #tpu.memory_space<vmem>>, vector<16x18xf32>
    %cst = arith.constant dense<0.000000e+00> : vector<8x18xf32>
    %2 = tpu.matmul %0, %1, %cst {dimension_numbers = #tpu.dot_dimension_numbers<[1], [0], [0], [1], [0, 0, 1, 1], [], []>, precision = #tpu.contract_precision<fp32>} : vector<8x16xf32>, vector<16x18xf32>, vector<8x18xf32> -> vector<8x18xf32>
    %c0_3 = arith.constant 0 : index
    %c0_4 = arith.constant 0 : index
    %3 = vector.load %arg3[%c0_3, %c0_4] : memref<8x18xf32, #tpu.memory_space<vmem>>, vector<8x18xf32>
    tpu.vector_store %arg3[%c0_3, %c0_4], %2 {strides = array<i32>} : memref<8x18xf32, #tpu.memory_space<vmem>>, vector<8x18xf32>,
    return
  }
  func.func @transform_0(%arg0: i32) -> (i32, i32) {
    %c0_i32 = arith.constant 0 : i32
    %c0_i32_0 = arith.constant 0 : i32
    return %arg0, %c0_i32 : i32, i32
  }
  func.func @transform_1(%arg0: i32) -> (i32, i32) {
    %c0_i32 = arith.constant 0 : i32
    %c0_i32_0 = arith.constant 0 : i32
    %c0_i32_1 = arith.constant 0 : i32
    return %c0_i32, %c0_i32_0 : i32, i32
  }
  func.func @transform_2(%arg0: i32) -> (i32, i32) {
    %c0_i32 = arith.constant 0 : i32
    %c0_i32_0 = arith.constant 0 : i32
    return %arg0, %c0_i32 : i32, i32
  }
}

</mosaic_0001>

<bundles_post_ra>
// kernel: tpu_custom_call.1
= control target key start
LH: loop header
LB: loop body
LE: loop exit
PB: predicated region body
PF: predicated region fallthrough
CT: control target
= control target key end

     0   :  { %7 = vsyncpa [#allocation3], 0  ;;  %s761_s0 = inlined_call_operand.hbm [shape: f32[8,16], index: 0, kind: input, shape index: {}]   ;;  %s762_s1 = inlined_call_operand.hbm [shape: f32[16,18], index: 1, kind: input, shape index: {}]   ;;  %s763_s2 = inlined_call_operand.hbm [shape: f32[8,18], index: 2, kind: output, shape index: {}]  }
   0x1   :  { %8 = vsyncpa [#allocation6], 0 }
   0x2   :  { %9 = vsyncpa [#allocation4], 0  ;;  %s689_s9 = smov [#allocation2]   ;;  %s690_s11 = smov [#allocation5]  }
   0x3   :  { %s16_s10 = sshll.u32 %s689_s9, 4  ;;  %s25_s12 = sshll.u32 %s690_s11, 4  ;;  %s17_s10 = int_to_ptr.vmem [resolvable:$true] %s16_s10  ;;  %s712_s12 = int_to_ptr.vmem [resolvable:$true] %s25_s12 }
   0x4   :  { %s617_s15 = scalar_lea.hbm %s761_s0, 128 }
   0x5   :  { %p618_p0 = scmp.ne.s32.totalorder %s761_s0, %s617_s15  ;;  %p621_p1 = scmp.lt.u32.totalorder %s617_s15, %s761_s0 }
   0x7   :  { %p623_p2 = pnand %p621_p1, %p618_p0 }
   0x9   :  { %626 = shalt.err (!%p623_p2)
}
   0xa   :  { %s627_s20 = scalar_lea.vmem %s17_s10, 128  ;;  %p632_p4 = scmp.lt.s32.totalorder %s17_s10, %s17_s10 }
   0xb   :  { %p628_p3 = scmp.ne.s32.totalorder %s17_s10, %s627_s20  ;;  %p633_p5 = scmp.lt.s32.totalorder %s627_s20, %s627_s20 }
   0xd   :  { %p634_p6 = por %p633_p5, %p632_p4 }
   0xf   :  { %p635_p7 = pnand %p634_p6, %p628_p3 }
  0x11   :  { %638 = shalt.err (!%p635_p7)
}
  0x12   :  { %19 = dma.hbm_to_vmem [thread:$0]  %s761_s0, 128, %s17_s10, [#allocation3]  }
  0x13   :  { %s639_s25 = scalar_lea.hbm %s762_s1, 256 }
  0x14   :  { %p640_p8 = scmp.ne.s32.totalorder %s762_s1, %s639_s25  ;;  %p643_p9 = scmp.lt.u32.totalorder %s639_s25, %s762_s1 }
  0x16   :  { %p645_p10 = pnand %p643_p9, %p640_p8 }
  0x18   :  { %648 = shalt.err (!%p645_p10)
}
  0x19   :  { %s649_s30 = scalar_lea.vmem %s712_s12, 256  ;;  %p654_p12 = scmp.lt.s32.totalorder %s712_s12, %s712_s12 }
  0x1a   :  { %p650_p11 = scmp.ne.s32.totalorder %s712_s12, %s649_s30  ;;  %p655_p13 = scmp.lt.s32.totalorder %s649_s30, %s649_s30 }
  0x1c   :  { %p656_p0 = por %p655_p13, %p654_p12 }
  0x1e   :  { %p657_p1 = pnand %p656_p0, %p650_p11 }
  0x20   :  { %660 = shalt.err (!%p657_p1)
}
  0x21   :  { %s691_s0 = smov 128   ;;  %s692_s3 = smov 8  }
  0x22   :  { %31 = dma.hbm_to_vmem [thread:$0]  %s762_s1, 256, %s712_s12, [#allocation6], %s691_s0, %s691_s0, %s692_s3  }
  0x23   :  { %683 = dma.done.wait [#allocation3], 128  }
  0x24   :  { %684 = vsyncadd [#allocation3], 4294967168 }
  0x25   :  { %685 = dma.done.wait [#allocation6], 256  }
  0x26   :  { %686 = vsyncadd [#allocation6], 4294967040  ;;  %v693_v0 = vmov 0.0|0.0   ;;  %vm694_vm0 = vmmov 0   ;;  %v695_v1 = vmov 0.0   ;;  %vm41_vm1 = vcmask 130048  }
  0x27   :  { %591 = vmatprep.subr.bf16.mxu0 %v693_v0  ;;  %565 = vmatprep.mubr.msk.f32.mxu0 %vm694_vm0, %v695_v1  ;;  %v39_v2 = vld [vmem:[#allocation5] sm:$0xff]  ;;  %v40_v3 = vld [vmem:[#allocation5 + $0x8] sm:$0xff]  ;;  %v38_v4 = vld [vmem:[#allocation2] sm:$0xff]  ;;  %s696_s1 = smov [#allocation7]   ;;  %vm504_vm2 = vcmask 146432  }
  0x28   :  { %582 = vmatprep.subr.bf16.mxu1 %v693_v0  ;;  %544 = vmatprep.mubr.msk.f32.mxu1 %vm694_vm0, %v695_v1  ;;  %v46_v5 = vand.u32 4294901760, %v39_v2  ;;  %v49_v6 = vand.u32 4294901760, %v40_v3  ;;  %v43_v7 = vsel %vm41_vm1, %v38_v4, 0  ;;  %s512_s6 = sshll.u32 %s696_s1, 4  ;;  %s513_s6 = int_to_ptr.vmem [resolvable:$true] %s512_s6 }
  0x29   :  { %v112_v8 = vand.u32 4294901760, %v43_v7  ;;  %s661_s7 = scalar_lea.vmem %s513_s6, 128  ;;  %p666_p3 = scmp.lt.s32.totalorder %s513_s6, %s513_s6 }
  0x2a   :  { %v583_v9 = vpack.c.bf16 %v49_v6, %v46_v5  ;;  %v124_v10 = vsub.f32 %v39_v2, %v46_v5  ;;  %v131_v11 = vsub.f32 %v40_v3, %v49_v6  ;;  %p662_p2 = scmp.ne.s32.totalorder %s513_s6, %s661_s7  ;;  %p667_p4 = scmp.lt.s32.totalorder %s661_s7, %s661_s7 }
  0x2b   :  { %v113_v12 = vsub.f32 %v43_v7, %v112_v8 }
  0x2c   :  { %593 = vmatpush3.bf16.msra.mxu0 %v583_v9  ;;  %584 = vmatpush3.bf16.msra.mxu1 %v583_v9  ;;  %v125_v13 = vand.u32 4294901760, %v124_v10  ;;  %v132_v14 = vand.u32 4294901760, %v131_v11  ;;  %v589_v24 = vpack.c.bf16 %v131_v11, %v124_v10  ;;  %p668_p5 = por %p667_p4, %p666_p3 }
  0x2d   :  { %v114_v15 = vand.u32 4294901760, %v113_v12  ;;  %585 = vmatprep.subr.bf16.mxu1 %v693_v0  ;;  %594 = vmatprep.subr.bf16.mxu0 %v693_v0 }
  0x2e   :  { %v126_v16 = vsub.f32 %v124_v10, %v125_v13  ;;  %v133_v17 = vsub.f32 %v131_v11, %v132_v14  ;;  %v595_v18 = vpack.c.bf16 %v132_v14, %v125_v13  ;;  %p669_p6 = pnand %p668_p5, %p662_p2 }
  0x2f   :  { %566 = vmatmul.mubr.f32.vlgmr.msra.gmra.mrb[0].mxu0 %v114_v15  ;;  %v115_v19 = vsub.f32 %v113_v12, %v114_v15 }
  0x30   :  { %v127_v20 = vand.u32 4294901760, %v126_v16  ;;  %v134_v21 = vand.u32 4294901760, %v133_v17  ;;  %596 = vmatpush3.bf16.msra.mxu0 %v595_v18  ;;  %572 = vmatprep.mubr.msk.f32.mxu0 %vm694_vm0, %v695_v1 }
  0x31   :  { %v116_v22 = vand.u32 4294901760, %v115_v19  ;;  %597 = vmatprep.subr.bf16.mxu0 %v693_v0 }
  0x32   :  { %v586_v23 = vpack.c.bf16 %v134_v21, %v127_v20 }
  0x33   :  { %545 = vmatmul.mubr.f32.vlgmr.msra.gmra.mrb[0].mxu1 %v116_v22 }
  0x34   :  { %587 = vmatpush3.bf16.msra.mxu1 %v586_v23  ;;  %551 = vmatprep.mubr.msk.f32.mxu1 %vm694_vm0, %v695_v1 }
  0x35   :  { %588 = vmatprep.subr.bf16.mxu1 %v693_v0 }
  0x37   :  { %573 = vmatmul.mubr.f32.vlgmr.msra.gmra.mrb[0].mxu0 %v112_v8 }
  0x38   :  { %599 = vmatpush3.bf16.msra.mxu0 %v583_v9  ;;  %579 = vmatprep.mubr.msk.f32.mxu0 %vm694_vm0, %v695_v1 }
  0x3b   :  { %552 = vmatmul.mubr.f32.vlgmr.msra.gmra.mrb[0].mxu1 %v112_v8 }
  0x3c   :  { %590 = vmatpush3.bf16.msra.mxu1 %v589_v24  ;;  %558 = vmatprep.mubr.msk.f32.mxu1 %vm694_vm0, %v695_v1 }
  0x3f   :  { %580 = vmatmul.mubr.f32.vlgmr.msra.gmra.mrb[0].mxu0 %v112_v8 }
  0x43   :  { %559 = vmatmul.mubr.f32.vlgmr.msra.gmra.mrb[0].mxu1 %v113_v12 }
 0x112   :  { %v500_v25 = vpop.f32.mrb[0].mxu0 }
 0x113   :  { %v581_v26 = vpop.f32.mrb[1].mxu0 }
 0x116   :  { %v275_v27 = vpop.f32.mrb[0].mxu1 }
 0x117   :  { %v600_v28 = vadd.f32 %v500_v25, %v275_v27  ;;  %v560_v29 = vpop.f32.mrb[1].mxu1 }
 0x119   :  { %505 = vst.msk [vmem:[#allocation7] sm:$0xff] %vm504_vm2, %v600_v28 }
 0x11a   :  { %672 = shalt.err (!%p669_p6)
}
 0x11b   :  { %s673_s10 = scalar_lea.hbm %s763_s2, 128 }
 0x11c   :  { %p674_p7 = scmp.ne.s32.totalorder %s763_s2, %s673_s10  ;;  %p677_p8 = scmp.lt.u32.totalorder %s673_s10, %s763_s2 }
 0x11e   :  { %p679_p9 = pnand %p677_p8, %p674_p7 }
 0x120   :  { %682 = shalt.err (!%p679_p9)
}
 0x121   :  { %515 = dma.vmem_to_hbm [thread:$0]  %s513_s6, 128, %s763_s2, [#allocation4]  }
 0x122   :  { %687 = dma.done.wait [#allocation4], 128  }
 0x123   :  { %688 = vsyncadd [#allocation4], 4294967168 }
 0x124   :  { %519 = vsyncpa [#allocation3], 1 }
 0x125   :  { %520 = vsyncpa [#allocation6], 1 }
 0x126   :  { %521 = vsyncpa [#allocation4], 1 }

</bundles_post_ra>
